<compile_context>
chip_gen: v6e
topology: v6e:2x2x1
jax: 0.10.0
libtpu: 0.0.40
codegen_flags: <defaults>
</compile_context>

<pallas_src>
import math
from functools import partial

import jax
import jax.numpy as jnp
from jax.experimental import pallas as pl
from jax.experimental.pallas import tpu as pltpu


# ---------------------------------------------------------------------------
# Kernels
# ---------------------------------------------------------------------------
def _lstm_gate_math(gates, c_prev):
    """Gate nonlinearities + state update on a [B, 4H] f32 pre-activation.

    Whole-block sigmoid + tanh (2 EUP passes) instead of four 32-lane slice
    activations; all elementwise math stays f32 (v5e-safe).
    """
    H = c_prev.shape[-1]
    sig = jax.nn.sigmoid(gates)
    th = jnp.tanh(gates)
    ingate = sig[:, 0 * H:1 * H]
    forgetgate = sig[:, 1 * H:2 * H]
    cellgate = th[:, 2 * H:3 * H]
    outgate = sig[:, 3 * H:4 * H]
    cy = forgetgate * c_prev + ingate * cellgate
    hy = outgate * jnp.tanh(cy)
    return hy, cy


def lstm_cell_kernel(x_ref, h_ref, c_ref, wih_ref, whh_ref, hy_ref, cy_ref):
    """Single-step LSTM cell (exact RNNCell.forward: one call == one step).

    x_ref   : [B, I]   f32
    h_ref   : [B, H]   f32 previous hidden state (aliased with hy output)
    c_ref   : [B, H]   f32 previous cell state   (aliased with cy output)
    wih_ref : [I, 4H]  bf16 pre-transposed w_ih
    whh_ref : [H, 4H]  bf16 pre-transposed w_hh
    """
    gates = (
        jnp.dot(x_ref[...].astype(jnp.bfloat16), wih_ref[...],
                preferred_element_type=jnp.float32)
        + jnp.dot(h_ref[...].astype(jnp.bfloat16), whh_ref[...],
                  preferred_element_type=jnp.float32))
    hy, cy = _lstm_gate_math(gates, c_ref[...])
    hy_ref[...] = hy.astype(hy_ref.dtype)
    cy_ref[...] = cy.astype(cy_ref.dtype)


def lstm_seq_kernel(x_ref, h0_ref, c0_ref, wih_ref, whh_ref,
                    hy_ref, cy_ref, h_scr, c_scr):
    """Time-fused LSTM: one grid step == one time step.

    x_ref        : [1, B, I]   f32 current input (streamed per step)
    h0_ref/c0_ref: [B, H]      f32 initial states (read only at t == 0)
    wih_ref      : [I, 4H]     bf16 (constant index_map -> DMA'd once)
    whh_ref      : [H, 4H]     bf16 (constant index_map -> DMA'd once)
    hy_ref/cy_ref: [Tc, B, H]  f32 output chunk, written back every Tc steps
    h_scr/c_scr  : [B, H]      f32 VMEM-carried recurrent state
    """
    t = pl.program_id(0)
    tc = hy_ref.shape[0]          # steps per output write-back chunk
    phase = t % tc

    @pl.when(t == 0)
    def _():
        h_scr[...] = h0_ref[...]
        c_scr[...] = c0_ref[...]

    gates = (
        jnp.dot(x_ref[0].astype(jnp.bfloat16), wih_ref[...],
                preferred_element_type=jnp.float32)
        + jnp.dot(h_scr[...].astype(jnp.bfloat16), whh_ref[...],
                  preferred_element_type=jnp.float32))
    hy, cy = _lstm_gate_math(gates, c_scr[...])

    # Carry state in VMEM across grid steps; stage outputs into the resident
    # (Tc, B, H) block so Pallas writes back one contiguous chunk per Tc steps.
    h_scr[...] = hy
    c_scr[...] = cy
    hy_ref[phase] = hy.astype(hy_ref.dtype)
    cy_ref[phase] = cy.astype(cy_ref.dtype)


# ---------------------------------------------------------------------------
# Wrappers
# ---------------------------------------------------------------------------
def prepare_weights(w_ih, w_hh):
    """One-time (module-init) weight prep: pre-transposed bf16 MXU operands."""
    return (jnp.transpose(w_ih).astype(jnp.bfloat16),
            jnp.transpose(w_hh).astype(jnp.bfloat16))


@jax.jit
def rnn_cell_forward(x, h0, c0, wih_t, whh_t):
    """RNNCell.forward (LSTM cell, bias=False, output_size == hidden_size)."""
    B = x.shape[0]
    H = c0.shape[1]
    vmem = pl.BlockSpec(memory_space=pltpu.MemorySpace.VMEM)
    hy, cy = pl.pallas_call(
        lstm_cell_kernel,
        out_shape=(jax.ShapeDtypeStruct((B, H), x.dtype),
                   jax.ShapeDtypeStruct((B, H), x.dtype)),
        in_specs=[vmem, vmem, vmem, vmem, vmem],
        out_specs=(vmem, vmem),
        # In-place carry of the recurrent state: h0 -> hy, c0 -> cy.
        input_output_aliases={1: 0, 2: 1},
    )(x, h0, c0, wih_t, whh_t)
    # TODO(synk): if output_size != hidden_size, apply hy @ w_ho.T afterwards.
    # TODO(synk): bias=False here; with bias=True add (b_ih + b_hh) to gates.
    return hy, cy


@partial(jax.jit, static_argnames=("steps_per_writeback",))
def rnn_cell_forward_seq(x_seq, h0, c0, wih_t, whh_t, steps_per_writeback=4):
    """Iterated RNNCell.forward over a sequence, fused into ONE pallas_call."""
    T, B, I = x_seq.shape
    H = c0.shape[1]
    G = wih_t.shape[1]
    tc = steps_per_writeback
    assert T % tc == 0, "seq length must be a multiple of steps_per_writeback"

    grid_spec = pltpu.PrefetchScalarGridSpec(
        num_scalar_prefetch=0,
        grid=(T,),
        in_specs=[
            pl.BlockSpec((1, B, I), lambda t: (t, 0, 0)),    # x_t streamed
            pl.BlockSpec((B, H), lambda t: (0, 0)),          # h0 (t == 0 only)
            pl.BlockSpec((B, H), lambda t: (0, 0)),          # c0 (t == 0 only)
            pl.BlockSpec((I, G), lambda t: (0, 0)),          # w_ih.T resident
            pl.BlockSpec((H, G), lambda t: (0, 0)),          # w_hh.T resident
        ],
        out_specs=(
            pl.BlockSpec((tc, B, H), lambda t: (t // tc, 0, 0)),  # hy chunks
            pl.BlockSpec((tc, B, H), lambda t: (t // tc, 0, 0)),  # cy chunks
        ),
        scratch_shapes=[
            pltpu.VMEM((B, H), jnp.float32),   # carried h
            pltpu.VMEM((B, H), jnp.float32),   # carried c
        ],
    )
    hy_seq, cy_seq = pl.pallas_call(
        lstm_seq_kernel,
        out_shape=(jax.ShapeDtypeStruct((T, B, H), x_seq.dtype),
                   jax.ShapeDtypeStruct((T, B, H), x_seq.dtype)),
        grid_spec=grid_spec,
        compiler_params=pltpu.CompilerParams(
            dimension_semantics=("arbitrary",)),   # time is a serial carry
    )(x_seq, h0, c0, wih_t, whh_t)
    # TODO(synk): for multiple independent sequences / layers / directions,
    #   add a leading "parallel" grid axis (fills v7x's 2nd TensorCore) and/or
    #   row-stack their batches into one LHS so B approaches the MXU row count.
    return hy_seq, cy_seq


# ---------------------------------------------------------------------------
# Pure-JAX references
# ---------------------------------------------------------------------------
def reference_step(x, h, c, w_ih, w_hh, mxu_dtype=jnp.float32):
    """One LSTM-cell step. mxu_dtype=bf16 mirrors the kernel's MXU precision;
    mxu_dtype=f32 (precision='highest') is the PyTorch f32 semantics."""
    gates = (
        jnp.dot(x.astype(mxu_dtype), w_ih.T.astype(mxu_dtype),
                preferred_element_type=jnp.float32, precision="highest")
        + jnp.dot(h.astype(mxu_dtype), w_hh.T.astype(mxu_dtype),
                  preferred_element_type=jnp.float32, precision="highest"))
    H = c.shape[1]
    i = jax.nn.sigmoid(gates[:, 0 * H:1 * H])
    f = jax.nn.sigmoid(gates[:, 1 * H:2 * H])
    g = jnp.tanh(gates[:, 2 * H:3 * H])
    o = jax.nn.sigmoid(gates[:, 3 * H:4 * H])
    cy = f * c + i * g
    hy = o * jnp.tanh(cy)
    return hy, cy


def reference_seq(x_seq, h0, c0, w_ih, w_hh, mxu_dtype=jnp.float32):
    h, c = h0, c0
    hs, cs = [], []
    for t in range(x_seq.shape[0]):
        h, c = reference_step(x_seq[t], h, c, w_ih, w_hh, mxu_dtype=mxu_dtype)
        hs.append(h)
        cs.append(c)
    return jnp.stack(hs, axis=0), jnp.stack(cs, axis=0)


# ---------------------------------------------------------------------------
# Demo / self-test
# ---------------------------------------------------------------------------
if __name__ == "__main__":
    # Module configuration (LSTM-like cell).
    gate_multiplier = 4
    batch = 8
    input_size = 32
    hidden_size = 32
    seq_len = 16
    gate_size = gate_multiplier * hidden_size  # 128

    key = jax.random.PRNGKey(0)
    k_x, k_wih, k_whh = jax.random.split(key, 3)

    # reset_parameters(): uniform(-stdev, stdev), stdev = 1/sqrt(hidden_size)
    stdev = 1.0 / math.sqrt(hidden_size)
    w_ih = jax.random.uniform(k_wih, (gate_size, input_size),
                              minval=-stdev, maxval=stdev, dtype=jnp.float32)
    w_hh = jax.random.uniform(k_whh, (gate_size, hidden_size),
                              minval=-stdev, maxval=stdev, dtype=jnp.float32)

    # Not batch_first: sequence laid out [T, B, I]; one step is x_seq[t].
    x_seq = jax.random.normal(k_x, (seq_len, batch, input_size),
                              dtype=jnp.float32)

    # forward() calls init_hidden(bsz) -> zero hidden states on first call.
    h0 = jnp.zeros((batch, hidden_size), dtype=jnp.float32)
    c0 = jnp.zeros((batch, hidden_size), dtype=jnp.float32)

    # One-time weight preparation (module-init time), outside the step path.
    wih_t, whh_t = jax.block_until_ready(prepare_weights(w_ih, w_hh))

    # --- single-step kernel: exactly the module's forward() ----------------
    hy1, cy1 = jax.block_until_ready(
        rnn_cell_forward(x_seq[0], h0, c0, wih_t, whh_t))
    hy1_bf, cy1_bf = reference_step(x_seq[0], h0, c0, w_ih, w_hh,
                                    mxu_dtype=jnp.bfloat16)
    hy1_f32, cy1_f32 = reference_step(x_seq[0], h0, c0, w_ih, w_hh,
                                      mxu_dtype=jnp.float32)
    assert jnp.allclose(hy1, hy1_bf, atol=1e-3, rtol=1e-3), "hy step mismatch"
    assert jnp.allclose(cy1, cy1_bf, atol=1e-3, rtol=1e-3), "cy step mismatch"
    # bf16 MXU operands vs. full-f32 PyTorch math -> relaxed tolerance.
    assert jnp.allclose(hy1, hy1_f32, atol=2e-2, rtol=2e-2), "hy f32 mismatch"
    assert jnp.allclose(cy1, cy1_f32, atol=2e-2, rtol=2e-2), "cy f32 mismatch"

    # --- time-fused kernel: the whole recurrence in one pallas_call --------
    hy_seq, cy_seq = jax.block_until_ready(
        rnn_cell_forward_seq(x_seq, h0, c0, wih_t, whh_t,
                             steps_per_writeback=4))
    hy_ref, cy_ref = reference_seq(x_seq, h0, c0, w_ih, w_hh,
                                   mxu_dtype=jnp.bfloat16)
    assert jnp.allclose(hy_seq, hy_ref, atol=2e-3, rtol=2e-3), "hy_seq mismatch"
    assert jnp.allclose(cy_seq, cy_ref, atol=2e-3, rtol=2e-3), "cy_seq mismatch"

    # First fused step must agree with the single-step kernel.
    assert jnp.allclose(hy1, hy_seq[0], atol=1e-5, rtol=1e-5), "seq[0] mismatch"
    assert jnp.allclose(cy1, cy_seq[0], atol=1e-5, rtol=1e-5), "seq[0] mismatch"

    print("KERNEL_OK")
</pallas_src>

<mosaic_0001>
module attributes {stable_mosaic.version = 11 : i64} {
  func.func @lstm_cell_kernel(%arg0: memref<8x32xf32, #tpu.memory_space<vmem>>, %arg1: memref<8x32xf32, #tpu.memory_space<vmem>>, %arg2: memref<8x32xf32, #tpu.memory_space<vmem>>, %arg3: memref<32x128xbf16, #tpu.memory_space<vmem>>, %arg4: memref<32x128xbf16, #tpu.memory_space<vmem>>, %arg5: memref<8x32xf32, #tpu.memory_space<vmem>>, %arg6: memref<8x32xf32, #tpu.memory_space<vmem>>) attributes {dimension_semantics = [], scalar_prefetch = 0 : i64, scratch_operands = 0 : i64, tpu.core_type = #tpu.core_type<tc>} {
    %c0 = arith.constant 0 : index
    %c0_0 = arith.constant 0 : index
    %0 = vector.load %arg0[%c0, %c0_0] : memref<8x32xf32, #tpu.memory_space<vmem>>, vector<8x32xf32>
    %1 = arith.truncf %0 : vector<8x32xf32> to vector<8x32xbf16>
    %c0_1 = arith.constant 0 : index
    %c0_2 = arith.constant 0 : index
    %2 = vector.load %arg3[%c0_1, %c0_2] : memref<32x128xbf16, #tpu.memory_space<vmem>>, vector<32x128xbf16>
    %cst = arith.constant dense<0.000000e+00> : vector<8x128xf32>
    %3 = tpu.matmul %1, %2, %cst {dimension_numbers = #tpu.dot_dimension_numbers<[1], [0], [0], [1], [0, 0, 1, 1], [], []>} : vector<8x32xbf16>, vector<32x128xbf16>, vector<8x128xf32> -> vector<8x128xf32>
    %c0_3 = arith.constant 0 : index
    %c0_4 = arith.constant 0 : index
    %4 = vector.load %arg1[%c0_3, %c0_4] : memref<8x32xf32, #tpu.memory_space<vmem>>, vector<8x32xf32>
    %5 = arith.truncf %4 : vector<8x32xf32> to vector<8x32xbf16>
    %c0_5 = arith.constant 0 : index
    %c0_6 = arith.constant 0 : index
    %6 = vector.load %arg4[%c0_5, %c0_6] : memref<32x128xbf16, #tpu.memory_space<vmem>>, vector<32x128xbf16>
    %cst_7 = arith.constant dense<0.000000e+00> : vector<8x128xf32>
    %7 = tpu.matmul %5, %6, %cst_7 {dimension_numbers = #tpu.dot_dimension_numbers<[1], [0], [0], [1], [0, 0, 1, 1], [], []>} : vector<8x32xbf16>, vector<32x128xbf16>, vector<8x128xf32> -> vector<8x128xf32>
    %8 = arith.addf %3, %7 : vector<8x128xf32>
    %c0_8 = arith.constant 0 : index
    %c0_9 = arith.constant 0 : index
    %9 = vector.load %arg2[%c0_8, %c0_9] : memref<8x32xf32, #tpu.memory_space<vmem>>, vector<8x32xf32>
    %10 = arith.negf %8 : vector<8x128xf32>
    %11 = math.exp %10 : vector<8x128xf32>
    %cst_10 = arith.constant 1.000000e+00 : f32
    %12 = vector.broadcast %cst_10 : f32 to vector<8x128xf32>
    %13 = arith.addf %12, %11 : vector<8x128xf32>
    %14 = arith.divf %12, %13 : vector<8x128xf32>
    %15 = math.tanh %8 : vector<8x128xf32>
    %16 = vector.extract_strided_slice %14 {offsets = [0, 0], sizes = [8, 32], strides = [1, 1]} : vector<8x128xf32> to vector<8x32xf32>
    %17 = vector.extract_strided_slice %14 {offsets = [0, 32], sizes = [8, 32], strides = [1, 1]} : vector<8x128xf32> to vector<8x32xf32>
    %18 = vector.extract_strided_slice %15 {offsets = [0, 64], sizes = [8, 32], strides = [1, 1]} : vector<8x128xf32> to vector<8x32xf32>
    %19 = vector.extract_strided_slice %14 {offsets = [0, 96], sizes = [8, 32], strides = [1, 1]} : vector<8x128xf32> to vector<8x32xf32>
    %20 = arith.mulf %17, %9 : vector<8x32xf32>
    %21 = arith.mulf %16, %18 : vector<8x32xf32>
    %22 = arith.addf %20, %21 : vector<8x32xf32>
    %23 = math.tanh %22 : vector<8x32xf32>
    %24 = arith.mulf %19, %23 : vector<8x32xf32>
    %c0_11 = arith.constant 0 : index
    %c0_12 = arith.constant 0 : index
    %25 = vector.load %arg5[%c0_11, %c0_12] : memref<8x32xf32, #tpu.memory_space<vmem>>, vector<8x32xf32>
    tpu.vector_store %arg5[%c0_11, %c0_12], %24 {strides = array<i32>} : memref<8x32xf32, #tpu.memory_space<vmem>>, vector<8x32xf32>,
    %c0_13 = arith.constant 0 : index
    %c0_14 = arith.constant 0 : index
    %26 = vector.load %arg6[%c0_13, %c0_14] : memref<8x32xf32, #tpu.memory_space<vmem>>, vector<8x32xf32>
    tpu.vector_store %arg6[%c0_13, %c0_14], %22 {strides = array<i32>} : memref<8x32xf32, #tpu.memory_space<vmem>>, vector<8x32xf32>,
    return
  }
}

</mosaic_0001>

<bundles_post_ra>
// kernel: rnn_cell_forward.1
= control target key start
LH: loop header
LB: loop body
LE: loop exit
PB: predicated region body
PF: predicated region fallthrough
CT: control target
= control target key end

     0   :  { %12 = vsyncpa [#allocation3], 0  ;;  %s487_s0 = inlined_call_operand.hbm [shape: f32[8,32], index: 0, kind: input, shape index: {}]   ;;  %s488_s1 = inlined_call_operand.hbm [shape: f32[8,32], index: 1, kind: input, shape index: {}, may-alias: {1,5}]   ;;  %s489_s2 = inlined_call_operand.hbm [shape: f32[8,32], index: 2, kind: input, shape index: {}, may-alias: {2,6}]   ;;  %s490_s3 = inlined_call_operand.vmem [shape: bf16[32,128], index: 3, kind: input, shape index: {}]   ;;  %s491_s4 = inlined_call_operand.vmem [shape: bf16[32,128], index: 4, kind: input, shape index: {}]   ;;  %s492_s5 = inlined_call_operand.hbm [shape: f32[8,32], index: 5, kind: output, shape index: {0}, may-alias: {1,5}]   ;;  %s493_s6 = inlined_call_operand.hbm [shape: f32[8,32], index: 6, kind: output, shape index: {1}, may-alias: {2,6}]  }
   0x1   :  { %13 = vsyncpa [#allocation6], 0 }
   0x2   :  { %14 = vsyncpa [#allocation4], 0 }
   0x3   :  { %15 = vsyncpa [#allocation10], 0  ;;  %s411_s21 = smov [#allocation5]   ;;  %s412_s23 = smov [#allocation2]  }
   0x4   :  { %s32_s22 = sshll.u32 %s411_s21, 4  ;;  %s22_s24 = sshll.u32 %s412_s23, 4  ;;  %s33_s22 = int_to_ptr.vmem [resolvable:$true] %s32_s22  ;;  %s23_s24 = int_to_ptr.vmem [resolvable:$true] %s22_s24 }
   0x5   :  { %s311_s25 = scalar_lea.vmem %s33_s22, 128  ;;  %p316_p1 = scmp.lt.s32.totalorder %s33_s22, %s33_s22 }
   0x6   :  { %p312_p0 = scmp.ne.s32.totalorder %s33_s22, %s311_s25  ;;  %p317_p2 = scmp.lt.s32.totalorder %s311_s25, %s311_s25 }
   0x8   :  { %p318_p3 = por %p317_p2, %p316_p1 }
   0xa   :  { %p319_p4 = pnand %p318_p3, %p312_p0 }
   0xc   :  { %322 = shalt.err (!%p319_p4)
}
   0xd   :  { %35 = dma.hbm_to_vmem [thread:$0]  %s488_s1, 128, %s33_s22, [#allocation6]  }
   0xe   :  { %s331_s28 = scalar_lea.vmem %s23_s24, 128  ;;  %p336_p6 = scmp.lt.s32.totalorder %s23_s24, %s23_s24 }
   0xf   :  { %p332_p5 = scmp.ne.s32.totalorder %s23_s24, %s331_s28  ;;  %p337_p7 = scmp.lt.s32.totalorder %s331_s28, %s331_s28 }
  0x11   :  { %p338_p8 = por %p337_p7, %p336_p6 }
  0x13   :  { %p339_p9 = pnand %p338_p8, %p332_p5 }
  0x15   :  { %342 = shalt.err (!%p339_p9)
}
  0x16   :  { %25 = dma.hbm_to_vmem [thread:$0]  %s487_s0, 128, %s23_s24, [#allocation3]  }
  0x17   :  { %s413_s7 = smov [#allocation7]  }
  0x18   :  { %s42_s8 = sshll.u32 %s413_s7, 4  ;;  %s43_s8 = int_to_ptr.vmem [resolvable:$true] %s42_s8 }
  0x19   :  { %s351_s9 = scalar_lea.vmem %s43_s8, 128  ;;  %p356_p11 = scmp.lt.s32.totalorder %s43_s8, %s43_s8 }
  0x1a   :  { %p352_p10 = scmp.ne.s32.totalorder %s43_s8, %s351_s9  ;;  %p357_p12 = scmp.lt.s32.totalorder %s351_s9, %s351_s9 }
  0x1c   :  { %p358_p13 = por %p357_p12, %p356_p11 }
  0x1e   :  { %p359_p0 = pnand %p358_p13, %p352_p10 }
  0x20   :  { %362 = shalt.err (!%p359_p0)
}
  0x21   :  { %45 = dma.hbm_to_vmem [thread:$0]  %s489_s2, 128, %s43_s8, [#allocation6]  }
  0x22   :  { %403 = dma.done.wait [#allocation3], 128  }
  0x23   :  { %404 = vsyncadd [#allocation3], 4294967168 }
  0x24   :  { %405 = dma.done.wait [#allocation6], 256  }
  0x25   :  { %406 = vsyncadd [#allocation6], 4294967040  ;;  %v414_v0 = vmov 0.0   ;;  %vm415_vm0 = vmmov 0   ;;  %v291_v1 = vld [vmem:[%s491_s4 + $0x8] sm:$0xff]   ;;  %v293_v3 = vld [vmem:[%s491_s4] sm:$0xff]  }
  0x26   :  { %265 = vmatprep.subr.bf16.mxu0 %v414_v0  ;;  %273 = vmatprep.subr.bf16.mxu1 %v414_v0  ;;  %v292_v2 = vld [vmem:[%s490_s3 + $0x8] sm:$0xff]   ;;  %v294_v4 = vld [vmem:[%s490_s3] sm:$0xff]   ;;  %vm84_vm1 = vcmask 261120   ;;  %s416_s3 = smov 64   ;;  %v183_v19 = vld [vmem:[#allocation7] sm:$0xff]  ;;  %s417_s4 = smov 32  }
  0x27   :  { %269 = vmatprep.mubr.msk.bf16.mxu0 %vm415_vm0, %v414_v0  ;;  %277 = vmatprep.mubr.msk.bf16.mxu1 %vm415_vm0, %v414_v0  ;;  %v66_v5 = vld [vmem:[#allocation5] sm:$0xff]  ;;  %v60_v6 = vld [vmem:[#allocation2] sm:$0xff]  ;;  %s418_s17 = smov 96   ;;  %s419_s18 = smov [#allocation9]  }
  0x28   :  { %266 = vmatpush3.bf16.msra.mxu0 %v291_v1  ;;  %274 = vmatpush3.bf16.msra.mxu1 %v292_v2  ;;  %v67_v7 = vpack.c.bf16 %v66_v5, %v66_v5  ;;  %v61_v8 = vpack.c.bf16 %v60_v6, %v60_v6  ;;  %s238_s19 = sshll.u32 %s419_s18, 4  ;;  %s239_s19 = int_to_ptr.vmem [resolvable:$true] %s238_s19 }
  0x29   :  { %267 = vmatprep.subr.bf16.mxu0 %v414_v0  ;;  %275 = vmatprep.subr.bf16.mxu1 %v414_v0  ;;  %s363_s20 = scalar_lea.vmem %s239_s19, 128  ;;  %p368_p2 = scmp.lt.s32.totalorder %s239_s19, %s239_s19 }
  0x2a   :  { %p364_p1 = scmp.ne.s32.totalorder %s239_s19, %s363_s20  ;;  %p369_p3 = scmp.lt.s32.totalorder %s363_s20, %s363_s20 }
  0x2c   :  { %268 = vmatpush3.bf16.msra.mxu0 %v293_v3  ;;  %276 = vmatpush3.bf16.msra.mxu1 %v294_v4  ;;  %p370_p4 = por %p369_p3, %p368_p2 }
  0x2e   :  { %p371_p5 = pnand %p370_p4, %p364_p1 }
  0x2f   :  { %270 = vmatmul.mubr.msk.bf16.vlgmr.msra.gmra.mxu0 %vm84_vm1, %v67_v7  ;;  %278 = vmatmul.mubr.msk.bf16.vlgmr.msra.gmra.mxu1 %vm84_vm1, %v61_v8 }
  0xef   :  { %v122_v9 = vpop.f32.mrf.mxu0  ;;  %v177_v10 = vpop.f32.mrf.mxu1 }
  0xf0   :  { %v178_v11 = vadd.f32 %v177_v10, %v122_v9 }
  0xf1   :  { %v271_v12 = vpop.f32.mrf.mxu0  ;;  %v279_v13 = vpop.f32.mrf.mxu1 }
  0xf2   :  { %295 = vtanh.f32 %v178_v11  ;;  %v258_v20 = vmul.f32 -1.442695, %v178_v11 }
  0xf3   :  { %v125_v14 = vpop.f32.mrf.mxu0  ;;  %v180_v15 = vpop.f32.mrf.mxu1 }
  0xf4   :  { %297 = vpow2.f32 %v258_v20 }
  0xf5   :  { %v272_v16 = vpop.f32.mrf.mxu0  ;;  %v280_v17 = vpop.f32.mrf.mxu1 }
  0xff   :  { %v296_v18 = vpop.eup %295 }
 0x100   :  { %197 = vrot.lane.b32.xlu0 %v296_v18, %s416_s3 }
 0x101   :  { %v298_v21 = vpop.eup %297 }
 0x102   :  { %v187_v22 = vadd.f32 1.0, %v298_v21 }
 0x104   :  { %192 = vrot.lane.b32.xlu0 %v183_v19, %s417_s4  ;;  %299 = vrcp.f32 %v187_v22 }
 0x111   :  { %v300_v23 = vpop.eup %299 }
 0x172   :  { %v198_v24 = vpop.permute.xlu0 %197 }
 0x173   :  { %v200_v25 = vmul.f32 %v300_v23, %v198_v24 }
 0x175   :  { %202 = vrot.lane.b32.xlu1 %v200_v25, %s417_s4 }
 0x176   :  { %v193_v26 = vpop.permute.xlu0 %192 }
 0x177   :  { %v195_v27 = vmul.f32 %v300_v23, %v193_v26 }
 0x1e7   :  { %v203_v28 = vpop.permute.xlu1 %202 }
 0x1e8   :  { %v205_v29 = vadd.f32 %v203_v28, %v195_v27 }
 0x1ea   :  { %301 = vtanh.f32 %v205_v29 }
 0x1f7   :  { %v302_v30 = vpop.eup %301 }
 0x1f8   :  { %208 = vrot.lane.b32.xlu1 %v302_v30, %s416_s3 }
 0x1fc   :  { %218 = vrot.lane.b32.xlu1 %v205_v29, %s418_s17 }
 0x26a   :  { %v209_v31 = vpop.permute.xlu1 %208 }
 0x26b   :  { %v211_v32 = vmul.f32 %v300_v23, %v209_v31 }
 0x26d   :  { %213 = vrot.lane.b32.xlu0 %v211_v32, %s417_s4 }
 0x26e   :  { %v219_v33 = vpop.permute.xlu1 %218 }
 0x26f   :  { %221 = vst.msk [vmem:[#allocation9] sm:$0xff] %vm84_vm1, %v219_v33 }
 0x270   :  { %374 = shalt.err (!%p371_p5)
}
 0x271   :  { %241 = dma.vmem_to_hbm [thread:$0]  %s239_s19, 128, %s493_s6, [#allocation10]  }
 0x272   :  { %s420_s23 = smov [#allocation8]  }
 0x273   :  { %s228_s24 = sshll.u32 %s420_s23, 4  ;;  %s229_s24 = int_to_ptr.vmem [resolvable:$true] %s228_s24 }
 0x274   :  { %s383_s25 = scalar_lea.vmem %s229_s24, 128  ;;  %p388_p7 = scmp.lt.s32.totalorder %s229_s24, %s229_s24 }
 0x275   :  { %p384_p6 = scmp.ne.s32.totalorder %s229_s24, %s383_s25  ;;  %p389_p8 = scmp.lt.s32.totalorder %s383_s25, %s383_s25 }
 0x277   :  { %p390_p9 = por %p389_p8, %p388_p7 }
 0x279   :  { %p391_p10 = pnand %p390_p9, %p384_p6 }
 0x2df   :  { %v214_v34 = vpop.permute.xlu0 %213 }
 0x2e0   :  { %216 = vst.msk [vmem:[#allocation8] sm:$0xff] %vm84_vm1, %v214_v34 }
 0x2e1   :  { %394 = shalt.err (!%p391_p10)
}
 0x2e2   :  { %231 = dma.vmem_to_hbm [thread:$0]  %s229_s24, 128, %s492_s5, [#allocation4]  }
 0x2e3   :  { %407 = dma.done.wait [#allocation4], 128  }
 0x2e4   :  { %408 = vsyncadd [#allocation4], 4294967168 }
 0x2e5   :  { %409 = dma.done.wait [#allocation10], 128  }
 0x2e6   :  { %410 = vsyncadd [#allocation10], 4294967168 }
 0x2e7   :  { %248 = vsyncpa [#allocation3], 1 }
 0x2e8   :  { %249 = vsyncpa [#allocation6], 1 }
 0x2e9   :  { %250 = vsyncpa [#allocation4], 1 }
 0x2ea   :  { %251 = vsyncpa [#allocation10], 1 }

</bundles_post_ra>
